<compile_context>
chip_gen: v7x
topology: tpu7x:2x2x1
jax: 0.10.0
libtpu: 0.0.40
codegen_flags: <defaults>
</compile_context>

<pallas_src>
import jax
import jax.numpy as jnp
import numpy as np
from jax.experimental import pallas as pl
from jax.experimental.pallas import tpu as pltpu


def gcnreg_3gc_kernel(a_ref, h_ref,
                      w1_ref, b1_ref, w2_ref, b2_ref, w3_ref, b3_ref,
                      wc1_ref, bc1_ref, wc3_ref, bc3_ref,
                      out_ref):
    """One grid step = one tile of BT graphs, computed end to end."""
    a = a_ref[...]                               # [BT, N, N] bf16 normalized adjacency
    bt, n, _ = a_ref.shape

    def graph_conv(x, w_ref, b_ref):
        # x: [BT, N, f_in]; returns relu(A_hat @ x @ W + b) in f32.
        f_in = x.shape[-1]
        f_out = w_ref.shape[-1]
        x_bf = x.astype(jnp.bfloat16)
        if f_in <= f_out:
            # (A @ x) @ W : the N x N contraction runs over the narrower feature dim.
            ax = jnp.einsum('bnm,bmf->bnf', a, x_bf,
                            preferred_element_type=jnp.float32)
            y = jnp.dot(ax.reshape(bt * n, f_in).astype(jnp.bfloat16),
                        w_ref[...],
                        preferred_element_type=jnp.float32)
            y = y.reshape(bt, n, f_out)
        else:
            # x @ W first (one big [BT*N, f_in] MXU call), then aggregate.
            xw = jnp.dot(x_bf.reshape(bt * n, f_in), w_ref[...],
                         preferred_element_type=jnp.float32)
            y = jnp.einsum('bnm,bmf->bnf', a,
                           xw.reshape(bt, n, f_out).astype(jnp.bfloat16),
                           preferred_element_type=jnp.float32)
        # bias + relu in f32 (VPU), once per tile.
        return jnp.maximum(y + b_ref[...], 0.0)

    h1 = graph_conv(h_ref[...], w1_ref, b1_ref)
    h2 = graph_conv(h1, w2_ref, b2_ref)
    h3 = graph_conv(h2, w3_ref, b3_ref)

    # dgl.mean_nodes readout, f32.
    # TODO(synk): assumes every graph has exactly N nodes; ragged DGL batches need a
    # per-graph node count (scalar prefetch) + node mask before this mean.
    hg = jnp.mean(h3, axis=1)                    # [BT, hidden]

    # MLP head, batched over the whole graph tile (M = BT, not 1).
    o = jnp.dot(hg.astype(jnp.bfloat16), wc1_ref[...],
                preferred_element_type=jnp.float32) + bc1_ref[...]
    o = jnp.maximum(o, 0.0)
    o = jnp.dot(o.astype(jnp.bfloat16), wc3_ref[...],
                preferred_element_type=jnp.float32) + bc3_ref[...]
    out_ref[...] = o                             # [BT, NC_PAD] lane-dense f32 store


def gcnreg_3gc_forward(a_hat, h, params, *, bt=8):
    """a_hat: [B, N, N] f32 normalized adjacency, h: [B, N, in_dim] f32 node features."""
    B, N, in_dim = h.shape
    hidden = params["w1"].shape[1]
    n_classes = params["wc3"].shape[1]

    # Lane-dense output: pad class dim up to a multiple of 128.
    nc_pad = 128 * pl.cdiv(n_classes, 128)
    # Batch tiling: pad B to a multiple of bt (padded graphs are all-zero, sliced off).
    num_tiles = pl.cdiv(B, bt)
    b_pad = num_tiles * bt

    def pad_to(x, shape):
        pads = [(0, s - d) for s, d in zip(shape, x.shape)]
        return jnp.pad(x, pads) if any(p[1] for p in pads) else x

    a_bf = pad_to(a_hat, (b_pad, N, N)).astype(jnp.bfloat16)
    h_bf = pad_to(h, (b_pad, N, in_dim)).astype(jnp.bfloat16)
    wc3_p = pad_to(params["wc3"], (hidden, nc_pad))
    bc3_p = pad_to(params["bc3"], (1, nc_pad))

    # Matmul operands in bf16 (MXU fast path); biases stay f32.
    w_bf = lambda w: w.astype(jnp.bfloat16)

    # Constant-index weight specs.  NOTE: at large `hidden`, mark these
    # pipeline_mode=pl.Buffered(1) (single-buffered) to halve their VMEM footprint
    # (matters on v7x's 64 MiB VMEM); irrelevant at hidden=32.
    full = lambda shape: pl.BlockSpec(shape, lambda t: tuple(0 for _ in shape))

    grid_spec = pltpu.PrefetchScalarGridSpec(
        num_scalar_prefetch=0,
        grid=(num_tiles,),
        in_specs=[
            pl.BlockSpec((bt, N, N), lambda t: (t, 0, 0)),        # A_hat tile
            pl.BlockSpec((bt, N, in_dim), lambda t: (t, 0, 0)),   # h tile
            full((in_dim, hidden)), full((1, hidden)),            # W1, b1
            full((hidden, hidden)), full((1, hidden)),            # W2, b2
            full((hidden, hidden)), full((1, hidden)),            # W3, b3
            full((hidden, hidden)), full((1, hidden)),            # Wc1, bc1
            full((hidden, nc_pad)), full((1, nc_pad)),            # Wc3, bc3 (padded)
        ],
        out_specs=pl.BlockSpec((bt, nc_pad), lambda t: (t, 0)),
    )

    out = pl.pallas_call(
        gcnreg_3gc_kernel,
        out_shape=jax.ShapeDtypeStruct((b_pad, nc_pad), jnp.float32),
        grid_spec=grid_spec,
        compiler_params=pltpu.CompilerParams(
            # Batch-tile axis is embarrassingly parallel -> megacore sharding on v7x.
            dimension_semantics=("parallel",)),
    )(a_bf, h_bf,
      w_bf(params["w1"]), params["b1"],
      w_bf(params["w2"]), params["b2"],
      w_bf(params["w3"]), params["b3"],
      w_bf(params["wc1"]), params["bc1"],
      w_bf(wc3_p), bc3_p)

    return out[:B, :n_classes]


def reference_forward(a_hat, h, p):
    def gc(x, w, b):
        return jax.nn.relu(a_hat @ (x @ w) + b)
    h1 = gc(h, p["w1"], p["b1"])
    h2 = gc(h1, p["w2"], p["b2"])
    h3 = gc(h2, p["w3"], p["b3"])
    hg = h3.mean(axis=1)
    o = jax.nn.relu(hg @ p["wc1"] + p["bc1"][0])
    return o @ p["wc3"] + p["bc3"][0]


if __name__ == "__main__":
    # Small shapes consistent with GCNReg_3gc(in_dim, hidden_dim, n_classes).
    B, N = 16, 8            # 16 graphs of 8 nodes each -> 2 grid tiles of 8 graphs
    in_dim, hidden, n_classes = 16, 32, 1

    key = jax.random.PRNGKey(0)
    keys = jax.random.split(key, 8)

    def init_w(k, shape):
        return jax.random.normal(k, shape, jnp.float32) / np.sqrt(shape[0])

    params = {
        "w1": init_w(keys[0], (in_dim, hidden)),
        "b1": jnp.zeros((1, hidden), jnp.float32),
        "w2": init_w(keys[1], (hidden, hidden)),
        "b2": jnp.zeros((1, hidden), jnp.float32),
        "w3": init_w(keys[2], (hidden, hidden)),
        "b3": jnp.zeros((1, hidden), jnp.float32),
        "wc1": init_w(keys[3], (hidden, hidden)),
        "bc1": 0.01 * jnp.ones((1, hidden), jnp.float32),
        "wc3": init_w(keys[4], (hidden, n_classes)),
        "bc3": jnp.zeros((1, n_classes), jnp.float32),
    }

    # Node features (g.ndata['h'])
    h = jax.random.normal(keys[5], (B, N, in_dim), jnp.float32)

    # Random undirected adjacency (no self-loops), symmetrically normalized as in
    # DGL GraphConv(norm='both') with degrees clamped to >= 1.
    raw = jax.random.uniform(keys[6], (B, N, N)) < 0.4
    upper = jnp.triu(raw.astype(jnp.float32), k=1)
    adj = upper + jnp.swapaxes(upper, 1, 2)
    deg = jnp.maximum(adj.sum(axis=-1), 1.0)      # fix: jnp.clip(a_min=...) kwarg removed
    d_inv_sqrt = 1.0 / jnp.sqrt(deg)
    a_hat = adj * d_inv_sqrt[:, :, None] * d_inv_sqrt[:, None, :]

    out = gcnreg_3gc_forward(a_hat, h, params, bt=8)
    out = jax.block_until_ready(out)

    ref = reference_forward(a_hat, h, params)
    # Loose tolerance: matmul operands go through the MXU in bf16 (f32 accumulation).
    np.testing.assert_allclose(np.asarray(out), np.asarray(ref), rtol=3e-2, atol=3e-2)
    print("KERNEL_OK")
</pallas_src>

<mosaic_0001>
module attributes {stable_mosaic.version = 11 : i64} {
  func.func @gcnreg_3gc_kernel(%arg0: i32, %arg1: memref<8x8x8xbf16, #tpu.memory_space<vmem>>, %arg2: memref<8x8x16xbf16, #tpu.memory_space<vmem>>, %arg3: memref<16x32xbf16, #tpu.memory_space<vmem>>, %arg4: memref<1x32xf32, #tpu.memory_space<vmem>>, %arg5: memref<32x32xbf16, #tpu.memory_space<vmem>>, %arg6: memref<1x32xf32, #tpu.memory_space<vmem>>, %arg7: memref<32x32xbf16, #tpu.memory_space<vmem>>, %arg8: memref<1x32xf32, #tpu.memory_space<vmem>>, %arg9: memref<32x32xbf16, #tpu.memory_space<vmem>>, %arg10: memref<1x32xf32, #tpu.memory_space<vmem>>, %arg11: memref<32x128xbf16, #tpu.memory_space<vmem>>, %arg12: memref<1x128xf32, #tpu.memory_space<vmem>>, %arg13: memref<8x128xf32, #tpu.memory_space<vmem>>) attributes {dimension_semantics = [#tpu.dimension_semantics<parallel>], iteration_bounds = array<i64: 2>, scalar_prefetch = 0 : i64, scratch_operands = 0 : i64, tpu.core_type = #tpu.core_type<tc>, window_params = [{transform_indices = @transform_0, window_bounds = array<i64: 8, 8, 8>}, {transform_indices = @transform_1, window_bounds = array<i64: 8, 8, 16>}, {pipeline_mode = #tpu.pipeline_mode<synchronous>, transform_indices = @transform_2, window_bounds = array<i64: 16, 32>}, {pipeline_mode = #tpu.pipeline_mode<synchronous>, transform_indices = @transform_3, window_bounds = array<i64: 1, 32>}, {pipeline_mode = #tpu.pipeline_mode<synchronous>, transform_indices = @transform_4, window_bounds = array<i64: 32, 32>}, {pipeline_mode = #tpu.pipeline_mode<synchronous>, transform_indices = @transform_5, window_bounds = array<i64: 1, 32>}, {pipeline_mode = #tpu.pipeline_mode<synchronous>, transform_indices = @transform_6, window_bounds = array<i64: 32, 32>}, {pipeline_mode = #tpu.pipeline_mode<synchronous>, transform_indices = @transform_7, window_bounds = array<i64: 1, 32>}, {pipeline_mode = #tpu.pipeline_mode<synchronous>, transform_indices = @transform_8, window_bounds = array<i64: 32, 32>}, {pipeline_mode = #tpu.pipeline_mode<synchronous>, transform_indices = @transform_9, window_bounds = array<i64: 1, 32>}, {pipeline_mode = #tpu.pipeline_mode<synchronous>, transform_indices = @transform_10, window_bounds = array<i64: 32, 128>}, {pipeline_mode = #tpu.pipeline_mode<synchronous>, transform_indices = @transform_11, window_bounds = array<i64: 1, 128>}, {transform_indices = @transform_12, window_bounds = array<i64: 8, 128>}]} {
    %c0 = arith.constant 0 : index
    %c0_0 = arith.constant 0 : index
    %c0_1 = arith.constant 0 : index
    %0 = vector.load %arg1[%c0, %c0_0, %c0_1] : memref<8x8x8xbf16, #tpu.memory_space<vmem>>, vector<8x8x8xbf16>
    %c0_2 = arith.constant 0 : index
    %c0_3 = arith.constant 0 : index
    %c0_4 = arith.constant 0 : index
    %1 = vector.load %arg2[%c0_2, %c0_3, %c0_4] : memref<8x8x16xbf16, #tpu.memory_space<vmem>>, vector<8x8x16xbf16>
    "tpu.trace_start"() <{level = 10 : i32, message = "bnm,bmf->bnf"}> : () -> ()
    %cst = arith.constant dense<0.000000e+00> : vector<8x8x16xf32>
    %2 = tpu.matmul %0, %1, %cst {dimension_numbers = #tpu.dot_dimension_numbers<[2], [1], [1], [2], [0, 0, 0, 1, 1, 2], [0], [0]>} : vector<8x8x8xbf16>, vector<8x8x16xbf16>, vector<8x8x16xf32> -> vector<8x8x16xf32>
    "tpu.trace_stop"() : () -> ()
    %3 = vector.shape_cast %2 : vector<8x8x16xf32> to vector<64x16xf32>
    %4 = arith.truncf %3 : vector<64x16xf32> to vector<64x16xbf16>
    %c0_5 = arith.constant 0 : index
    %c0_6 = arith.constant 0 : index
    %5 = vector.load %arg3[%c0_5, %c0_6] : memref<16x32xbf16, #tpu.memory_space<vmem>>, vector<16x32xbf16>
    %cst_7 = arith.constant dense<0.000000e+00> : vector<64x32xf32>
    %6 = tpu.matmul %4, %5, %cst_7 {dimension_numbers = #tpu.dot_dimension_numbers<[1], [0], [0], [1], [0, 0, 1, 1], [], []>} : vector<64x16xbf16>, vector<16x32xbf16>, vector<64x32xf32> -> vector<64x32xf32>
    %7 = vector.shape_cast %6 : vector<64x32xf32> to vector<8x8x32xf32>
    %c0_8 = arith.constant 0 : index
    %c0_9 = arith.constant 0 : index
    %8 = vector.load %arg4[%c0_8, %c0_9] : memref<1x32xf32, #tpu.memory_space<vmem>>, vector<1x32xf32>
    %9 = vector.shape_cast %8 : vector<1x32xf32> to vector<1x1x32xf32>
    %10 = vector.broadcast %9 : vector<1x1x32xf32> to vector<8x8x32xf32>
    %11 = arith.addf %7, %10 : vector<8x8x32xf32>
    %cst_10 = arith.constant 0.000000e+00 : f32
    %12 = vector.broadcast %cst_10 : f32 to vector<8x8x32xf32>
    %13 = arith.maximumf %11, %12 : vector<8x8x32xf32>
    %14 = arith.truncf %13 : vector<8x8x32xf32> to vector<8x8x32xbf16>
    "tpu.trace_start"() <{level = 10 : i32, message = "bnm,bmf->bnf"}> : () -> ()
    %cst_11 = arith.constant dense<0.000000e+00> : vector<8x8x32xf32>
    %15 = tpu.matmul %0, %14, %cst_11 {dimension_numbers = #tpu.dot_dimension_numbers<[2], [1], [1], [2], [0, 0, 0, 1, 1, 2], [0], [0]>} : vector<8x8x8xbf16>, vector<8x8x32xbf16>, vector<8x8x32xf32> -> vector<8x8x32xf32>
    "tpu.trace_stop"() : () -> ()
    %16 = vector.shape_cast %15 : vector<8x8x32xf32> to vector<64x32xf32>
    %17 = arith.truncf %16 : vector<64x32xf32> to vector<64x32xbf16>
    %c0_12 = arith.constant 0 : index
    %c0_13 = arith.constant 0 : index
    %18 = vector.load %arg5[%c0_12, %c0_13] : memref<32x32xbf16, #tpu.memory_space<vmem>>, vector<32x32xbf16>
    %cst_14 = arith.constant dense<0.000000e+00> : vector<64x32xf32>
    %19 = tpu.matmul %17, %18, %cst_14 {dimension_numbers = #tpu.dot_dimension_numbers<[1], [0], [0], [1], [0, 0, 1, 1], [], []>} : vector<64x32xbf16>, vector<32x32xbf16>, vector<64x32xf32> -> vector<64x32xf32>
    %20 = vector.shape_cast %19 : vector<64x32xf32> to vector<8x8x32xf32>
    %c0_15 = arith.constant 0 : index
    %c0_16 = arith.constant 0 : index
    %21 = vector.load %arg6[%c0_15, %c0_16] : memref<1x32xf32, #tpu.memory_space<vmem>>, vector<1x32xf32>
    %22 = vector.shape_cast %21 : vector<1x32xf32> to vector<1x1x32xf32>
    %23 = vector.broadcast %22 : vector<1x1x32xf32> to vector<8x8x32xf32>
    %24 = arith.addf %20, %23 : vector<8x8x32xf32>
    %cst_17 = arith.constant 0.000000e+00 : f32
    %25 = vector.broadcast %cst_17 : f32 to vector<8x8x32xf32>
    %26 = arith.maximumf %24, %25 : vector<8x8x32xf32>
    %27 = arith.truncf %26 : vector<8x8x32xf32> to vector<8x8x32xbf16>
    "tpu.trace_start"() <{level = 10 : i32, message = "bnm,bmf->bnf"}> : () -> ()
    %cst_18 = arith.constant dense<0.000000e+00> : vector<8x8x32xf32>
    %28 = tpu.matmul %0, %27, %cst_18 {dimension_numbers = #tpu.dot_dimension_numbers<[2], [1], [1], [2], [0, 0, 0, 1, 1, 2], [0], [0]>} : vector<8x8x8xbf16>, vector<8x8x32xbf16>, vector<8x8x32xf32> -> vector<8x8x32xf32>
    "tpu.trace_stop"() : () -> ()
    %29 = vector.shape_cast %28 : vector<8x8x32xf32> to vector<64x32xf32>
    %30 = arith.truncf %29 : vector<64x32xf32> to vector<64x32xbf16>
    %c0_19 = arith.constant 0 : index
    %c0_20 = arith.constant 0 : index
    %31 = vector.load %arg7[%c0_19, %c0_20] : memref<32x32xbf16, #tpu.memory_space<vmem>>, vector<32x32xbf16>
    %cst_21 = arith.constant dense<0.000000e+00> : vector<64x32xf32>
    %32 = tpu.matmul %30, %31, %cst_21 {dimension_numbers = #tpu.dot_dimension_numbers<[1], [0], [0], [1], [0, 0, 1, 1], [], []>} : vector<64x32xbf16>, vector<32x32xbf16>, vector<64x32xf32> -> vector<64x32xf32>
    %33 = vector.shape_cast %32 : vector<64x32xf32> to vector<8x8x32xf32>
    %c0_22 = arith.constant 0 : index
    %c0_23 = arith.constant 0 : index
    %34 = vector.load %arg8[%c0_22, %c0_23] : memref<1x32xf32, #tpu.memory_space<vmem>>, vector<1x32xf32>
    %35 = vector.shape_cast %34 : vector<1x32xf32> to vector<1x1x32xf32>
    %36 = vector.broadcast %35 : vector<1x1x32xf32> to vector<8x8x32xf32>
    %37 = arith.addf %33, %36 : vector<8x8x32xf32>
    %cst_24 = arith.constant 0.000000e+00 : f32
    %38 = vector.broadcast %cst_24 : f32 to vector<8x8x32xf32>
    %39 = arith.maximumf %37, %38 : vector<8x8x32xf32>
    %cst_25 = arith.constant dense<0.000000e+00> : vector<8x32xf32>
    %40 = vector.multi_reduction <add>, %39, %cst_25 [1] : vector<8x8x32xf32> to vector<8x32xf32>
    %cst_26 = arith.constant 8.000000e+00 : f32
    %41 = vector.broadcast %cst_26 : f32 to vector<8x32xf32>
    %42 = arith.divf %40, %41 : vector<8x32xf32>
    %43 = arith.truncf %42 : vector<8x32xf32> to vector<8x32xbf16>
    %c0_27 = arith.constant 0 : index
    %c0_28 = arith.constant 0 : index
    %44 = vector.load %arg9[%c0_27, %c0_28] : memref<32x32xbf16, #tpu.memory_space<vmem>>, vector<32x32xbf16>
    %cst_29 = arith.constant dense<0.000000e+00> : vector<8x32xf32>
    %45 = tpu.matmul %43, %44, %cst_29 {dimension_numbers = #tpu.dot_dimension_numbers<[1], [0], [0], [1], [0, 0, 1, 1], [], []>} : vector<8x32xbf16>, vector<32x32xbf16>, vector<8x32xf32> -> vector<8x32xf32>
    %c0_30 = arith.constant 0 : index
    %c0_31 = arith.constant 0 : index
    %46 = vector.load %arg10[%c0_30, %c0_31] : memref<1x32xf32, #tpu.memory_space<vmem>>, vector<1x32xf32>
    %47 = vector.broadcast %46 : vector<1x32xf32> to vector<8x32xf32>
    %48 = arith.addf %45, %47 : vector<8x32xf32>
    %cst_32 = arith.constant 0.000000e+00 : f32
    %49 = vector.broadcast %cst_32 : f32 to vector<8x32xf32>
    %50 = arith.maximumf %48, %49 : vector<8x32xf32>
    %51 = arith.truncf %50 : vector<8x32xf32> to vector<8x32xbf16>
    %c0_33 = arith.constant 0 : index
    %c0_34 = arith.constant 0 : index
    %52 = vector.load %arg11[%c0_33, %c0_34] : memref<32x128xbf16, #tpu.memory_space<vmem>>, vector<32x128xbf16>
    %cst_35 = arith.constant dense<0.000000e+00> : vector<8x128xf32>
    %53 = tpu.matmul %51, %52, %cst_35 {dimension_numbers = #tpu.dot_dimension_numbers<[1], [0], [0], [1], [0, 0, 1, 1], [], []>} : vector<8x32xbf16>, vector<32x128xbf16>, vector<8x128xf32> -> vector<8x128xf32>
    %c0_36 = arith.constant 0 : index
    %c0_37 = arith.constant 0 : index
    %54 = vector.load %arg12[%c0_36, %c0_37] : memref<1x128xf32, #tpu.memory_space<vmem>>, vector<1x128xf32>
    %55 = vector.broadcast %54 : vector<1x128xf32> to vector<8x128xf32>
    %56 = arith.addf %53, %55 : vector<8x128xf32>
    %c0_38 = arith.constant 0 : index
    %c0_39 = arith.constant 0 : index
    %57 = vector.load %arg13[%c0_38, %c0_39] : memref<8x128xf32, #tpu.memory_space<vmem>>, vector<8x128xf32>
    tpu.vector_store %arg13[%c0_38, %c0_39], %56 {strides = array<i32>} : memref<8x128xf32, #tpu.memory_space<vmem>>, vector<8x128xf32>,
    return
  }
  func.func @transform_0(%arg0: i32) -> (i32, i32, i32) {
    %c0_i32 = arith.constant 0 : i32
    %c0_i32_0 = arith.constant 0 : i32
    %c0_i32_1 = arith.constant 0 : i32
    return %arg0, %c0_i32, %c0_i32_0 : i32, i32, i32
  }
  func.func @transform_1(%arg0: i32) -> (i32, i32, i32) {
    %c0_i32 = arith.constant 0 : i32
    %c0_i32_0 = arith.constant 0 : i32
    %c0_i32_1 = arith.constant 0 : i32
    return %arg0, %c0_i32, %c0_i32_0 : i32, i32, i32
  }
  func.func @transform_2(%arg0: i32) -> (i32, i32) {
    %c0_i32 = arith.constant 0 : i32
    %c0_i32_0 = arith.constant 0 : i32
    %c0_i32_1 = arith.constant 0 : i32
    return %c0_i32, %c0_i32_0 : i32, i32
  }
  func.func @transform_3(%arg0: i32) -> (i32, i32) {
    %c0_i32 = arith.constant 0 : i32
    %c0_i32_0 = arith.constant 0 : i32
    %c0_i32_1 = arith.constant 0 : i32
    return %c0_i32, %c0_i32_0 : i32, i32
  }
  func.func @transform_4(%arg0: i32) -> (i32, i32) {
    %c0_i32 = arith.constant 0 : i32
    %c0_i32_0 = arith.constant 0 : i32
    %c0_i32_1 = arith.constant 0 : i32
    return %c0_i32, %c0_i32_0 : i32, i32
  }
  func.func @transform_5(%arg0: i32) -> (i32, i32) {
    %c0_i32 = arith.constant 0 : i32
    %c0_i32_0 = arith.constant 0 : i32
    %c0_i32_1 = arith.constant 0 : i32
    return %c0_i32, %c0_i32_0 : i32, i32
  }
  func.func @transform_6(%arg0: i32) -> (i32, i32) {
    %c0_i32 = arith.constant 0 : i32
    %c0_i32_0 = arith.constant 0 : i32
    %c0_i32_1 = arith.constant 0 : i32
    return %c0_i32, %c0_i32_0 : i32, i32
  }
  func.func @transform_7(%arg0: i32) -> (i32, i32) {
    %c0_i32 = arith.constant 0 : i32
    %c0_i32_0 = arith.constant 0 : i32
    %c0_i32_1 = arith.constant 0 : i32
    return %c0_i32, %c0_i32_0 : i32, i32
  }
  func.func @transform_8(%arg0: i32) -> (i32, i32) {
    %c0_i32 = arith.constant 0 : i32
    %c0_i32_0 = arith.constant 0 : i32
    %c0_i32_1 = arith.constant 0 : i32
    return %c0_i32, %c0_i32_0 : i32, i32
  }
  func.func @transform_9(%arg0: i32) -> (i32, i32) {
    %c0_i32 = arith.constant 0 : i32
    %c0_i32_0 = arith.constant 0 : i32
    %c0_i32_1 = arith.constant 0 : i32
    return %c0_i32, %c0_i32_0 : i32, i32
  }
  func.func @transform_10(%arg0: i32) -> (i32, i32) {
    %c0_i32 = arith.constant 0 : i32
    %c0_i32_0 = arith.constant 0 : i32
    %c0_i32_1 = arith.constant 0 : i32
    return %c0_i32, %c0_i32_0 : i32, i32
  }
  func.func @transform_11(%arg0: i32) -> (i32, i32) {
    %c0_i32 = arith.constant 0 : i32
    %c0_i32_0 = arith.constant 0 : i32
    %c0_i32_1 = arith.constant 0 : i32
    return %c0_i32, %c0_i32_0 : i32, i32
  }
  func.func @transform_12(%arg0: i32) -> (i32, i32) {
    %c0_i32 = arith.constant 0 : i32
    %c0_i32_0 = arith.constant 0 : i32
    return %arg0, %c0_i32 : i32, i32
  }
}

</mosaic_0001>

<bundles_post_ra>
// kernel: tpu_custom_call.1
= control target key start
LH: loop header
LB: loop body
LE: loop exit
PB: predicated region body
PF: predicated region fallthrough
CT: control target
= control target key end

     0   :  { %s3364_s0 = inlined_call_operand.vmem [shape: bf16[16,8,8], index: 0, kind: input, shape index: {}]   ;;  %s3365_s1 = inlined_call_operand.vmem [shape: bf16[16,8,16], index: 1, kind: input, shape index: {}]   ;;  %s3366_s2 = inlined_call_operand.hbm [shape: bf16[16,32], index: 2, kind: input, shape index: {}]   ;;  %s3367_s3 = inlined_call_operand.vmem [shape: f32[1,32], index: 3, kind: input, shape index: {}]   ;;  %s3368_s4 = inlined_call_operand.vmem [shape: bf16[32,32], index: 4, kind: input, shape index: {}]   ;;  %s3369_s5 = inlined_call_operand.vmem [shape: f32[1,32], index: 5, kind: input, shape index: {}]   ;;  %s3370_s6 = inlined_call_operand.vmem [shape: bf16[32,32], index: 6, kind: input, shape index: {}]   ;;  %s3371_s7 = inlined_call_operand.hbm [shape: f32[1,32], index: 7, kind: input, shape index: {}]   ;;  %s3372_s8 = inlined_call_operand.vmem [shape: bf16[32,32], index: 8, kind: input, shape index: {}]   ;;  %s3373_s9 = inlined_call_operand.hbm [shape: f32[1,32], index: 9, kind: input, shape index: {}]   ;;  %s3374_s10 = inlined_call_operand.vmem [shape: bf16[32,128], index: 10, kind: input, shape index: {}]   ;;  %s3375_s11 = inlined_call_operand.vmem [shape: f32[1,128], index: 11, kind: input, shape index: {}]   ;;  %s3376_s12 = inlined_call_operand.hbm [shape: f32[16,128], index: 12, kind: output, shape index: {}]  }
   0x1   :  { %3386 = sst [smem:[#allocation18_spill]] %s3371_s7 }
   0x2   :  { %17 = vsyncpa [#allocation3], 0 }
   0x3   :  { %18 = vsyncpa [#allocation6], 0 }
   0x4   :  { %19 = vsyncpa [#allocation4], 0 }
   0x5   :  { %21 = vsyncpa [#allocation4 + $0x1], 0  ;;  %s2924_s21 = smov 0   ;;  %s2926_s22 = smov 0  }
   0x6   :  { %s2928_s23 = smov 0   ;;  %s2930_s24 = smov 0  }
   0x7 LB: > { %3387 = sst [smem:[#allocation12_spill]] %s2837_s21  ;;  %s2945_s25 = sadd.s32 4294967295, %s2849_s24   ;;  %s2849_s24 = sphi %s2930_s24, %s3409_s24   ;;  %s2845_s23 = sphi %s2928_s23, %s3411_s23   ;;  %s2841_s22 = sphi %s2926_s22, %s3413_s22   ;;  %s2837_s21 = sphi %s2924_s21, %s3412_s21  }
   0x8   : > { %3388 = sst [smem:[#allocation13_spill]] %s2845_s23  ;;  %s2276_s26 = sadd.s32 4294967294, %s2849_s24  }
   0x9   : > { %3389 = sst [smem:[#allocation14_spill]] %s2849_s24  ;;  %s2949_s27 = sadd.s32 1, %s2849_s24  }
   0xa   : > { %3390 = sst [smem:[#allocation15_spill]] %s2949_s27  ;;  %s296_s28 = sadd.s32 1, %s2845_s23 }
   0xb   : > { %s293_s29 = ssub.s32 %s2849_s24, %s2949_s27  ;;  %p306_p0 = scmp.ne.s32.totalorder %s2845_s23, %s2841_s22 }
   0xc   : > { %p294_p1 = scmp.eq.s32.totalorder %s293_s29, 0  ;;  %p307_p2 = scmp.eq.s32.totalorder %s2945_s25, 1 }
   0xd   : > { %p312_p3 = scmp.ne.s32.totalorder %s2841_s22, %s2837_s21  ;;  %p313_p4 = scmp.eq.s32.totalorder %s2276_s26, 1 }
   0xe   : > { %s2960_s30 = scalar_select %p294_p1, %s2845_s23, %s296_s28  }
   0xf   : > { %p2962_p5 = por %p307_p2, %p306_p0  ;;  %p2966_p6 = por %p313_p4, %p312_p3 }
  0x10   : > { %3391 = sst [smem:[#allocation16_spill]] %s2960_s30  ;;  %p2277_p7 = scmp.ge.s32.totalorder %s2849_s24, 1 }
  0x11   : > { %s3392_s13 = scalar_select %p2962_p5, 1, 0 }
  0x12   : > { %s3393_s14 = scalar_select %p2966_p6, 1, 0 }
  0x13   : > { %p320_p8 = scmp.lt.s32.totalorder %s2849_s24, 3  ;;  %p3381_p9 = scmp.eq.s32.totalorder %s2945_s25, 0 }
  0x14   : > { %3394 = sst [smem:[#allocation17_spill]] %s3393_s14  ;;  %s2851_s16 = smov [#allocation5]  }
  0x15   : > { %p2973_p10 = pnand %p2277_p7, %p320_p8  ;;  %s358_s17 = sshll.u32 %s2851_s16, 4  ;;  %s359_s17 = int_to_ptr.vmem [resolvable:$true] %s358_s17 }
  0x16   : > { %s2852_s18 = smov [#allocation2]   ;;  %s2853_s26 = smov [#allocation7]  }
  0x17   : > { %s3395_s15 = scalar_select %p2973_p10, 1, 0 }
  0x18   : > { %p2626_p11 = pneg %p2973_p10  ;;  %s332_s19 = sshll.u32 %s2852_s18, 4  ;;  %s2985_s19 = int_to_ptr.vmem [resolvable:$true] %s332_s19 }
  0x19   : > { %s2987_s28 = sshll.u32 %s2853_s26, 4  ;;  %s3397_s7 = sld [smem:[#allocation18_spill]]  ;;  %s373_s28 = int_to_ptr.vmem [resolvable:$true] %s2987_s28 }
  0x1a   : > { %p2981_p12 = pnand %p3381_p9, %p2626_p11 }
  0x1c   : > { %p2997_p0 = pneg %p2981_p12 }
  0x1f   : > { %s2695_s16 = scalar_lea.hbm %s3397_s7, 16 }
  0x20   : > { %p2696_p13 = scmp.ne.s32.totalorder %s3397_s7, %s2695_s16  ;;  %p2702_p3 = scmp.lt.u32.totalorder %s2695_s16, %s3397_s7 }
  0x22   : > { %p2698_p1 = pnand %p2997_p0, %p2696_p13 }
  0x24   : > { %p2699_p2 = pneg %p2698_p1 }
  0x26   : > { %p2704_p4 = pnand %p2702_p3, %p2699_p2 }
  0x28   : > { %2707 = shalt.err (!%p2704_p4)
}
  0x29   : > { %s2708_s30 = scalar_lea.vmem %s359_s17, 16  ;;  %s2715_s23 = scalar_lea.vmem %s359_s17, 32 }
  0x2a   : > { %p2709_p7 = scmp.ne.s32.totalorder %s359_s17, %s2708_s30  ;;  %p2716_p9 = scmp.lt.s32.totalorder %s359_s17, %s359_s17 }
  0x2b   : > { %p2717_p6 = scmp.lt.s32.totalorder %s2715_s23, %s2708_s30 }
  0x2c   : > { %p2711_p8 = pnand %p2709_p7, %p2997_p0 }
  0x2d   : > { %p2718_p5 = por %p2717_p6, %p2716_p9 }
  0x2e   : > { %p2712_p11 = pneg %p2711_p8 }
  0x30   : > { %p2719_p10 = pnand %p2718_p5, %p2712_p11 }
  0x32   : > { %2722 = shalt.err (!%p2719_p10)
}
  0x33   : > { %2632 = dma.hbm_to_vmem [thread:$0]  (!%p2981_p12), %s3397_s7, 16, %s359_s17, [#allocation6]  }
  0x34   : > { %s2723_s26 = scalar_lea.hbm %s3366_s2, 128 }
  0x35   : > { %p2724_p13 = scmp.ne.s32.totalorder %s3366_s2, %s2723_s26  ;;  %p2730_p5 = scmp.lt.u32.totalorder %s2723_s26, %s3366_s2 }
  0x37   : > { %p2726_p1 = pnand %p2724_p13, %p2997_p0 }
  0x39   : > { %p2727_p6 = pneg %p2726_p1 }
  0x3b   : > { %p2732_p9 = pnand %p2730_p5, %p2727_p6 }
  0x3d   : > { %2735 = shalt.err (!%p2732_p9)
}
  0x3e   : > { %s2736_s17 = scalar_lea.vmem %s2985_s19, 128  ;;  %p2744_p4 = scmp.lt.s32.totalorder %s2985_s19, %s2985_s19 }
  0x3f   : > { %p2737_p10 = scmp.ne.s32.totalorder %s2985_s19, %s2736_s17  ;;  %p2745_p7 = scmp.lt.s32.totalorder %s2736_s17, %s2736_s17 }
  0x41   : > { %p2739_p2 = pnand %p2737_p10, %p2997_p0  ;;  %p2746_p8 = por %p2745_p7, %p2744_p4 }
  0x43   : > { %p2740_p3 = pneg %p2739_p2 }
  0x45   : > { %p2747_p11 = pnand %p2746_p8, %p2740_p3 }
  0x47   : > { %2750 = shalt.err (!%p2747_p11)
}
  0x48   : > { %s2854_s21 = smov 64   ;;  %s2855_s24 = smov 4  }
  0x49   : > { %2629 = dma.hbm_to_vmem [thread:$0]  (!%p2981_p12), %s3366_s2, 128, %s2985_s19, [#allocation3], %s2854_s21, %s2854_s21, %s2855_s24  }
  0x4a   : > { %s2751_s26 = scalar_lea.hbm %s3373_s9, 16 }
  0x4b   : > { %p2752_p13 = scmp.ne.s32.totalorder %s3373_s9, %s2751_s26  ;;  %p2758_p5 = scmp.lt.u32.totalorder %s2751_s26, %s3373_s9 }
  0x4d   : > { %p2754_p1 = pnand %p2752_p13, %p2997_p0 }
  0x4f   : > { %p2755_p6 = pneg %p2754_p1 }
  0x51   : > { %p2760_p9 = pnand %p2758_p5, %p2755_p6 }
  0x53   : > { %2763 = shalt.err (!%p2760_p9)
}
  0x54   : > { %s2764_s27 = scalar_lea.vmem %s373_s28, 16  ;;  %s2771_s19 = scalar_lea.vmem %s373_s28, 32 }
  0x55   : > { %p2765_p10 = scmp.ne.s32.totalorder %s373_s28, %s2764_s27  ;;  %p2772_p4 = scmp.lt.s32.totalorder %s373_s28, %s373_s28 }
  0x56   : > { %p2773_p7 = scmp.lt.s32.totalorder %s2771_s19, %s2764_s27 }
  0x57   : > { %p2767_p2 = pnand %p2765_p10, %p2997_p0 }
  0x58   : > { %p2774_p8 = por %p2773_p7, %p2772_p4 }
  0x59   : > { %p2768_p3 = pneg %p2767_p2 }
  0x5b   : > { %p2775_p11 = pnand %p2774_p8, %p2768_p3 }
  0x5d   : > { %2778 = shalt.err (!%p2775_p11)
}
  0x5e   : > { %2635 = dma.hbm_to_vmem [thread:$0]  (!%p2981_p12), %s3373_s9, 16, %s373_s28, [#allocation6]  }
  0x5f   : > { %p3399_p13 = scmp.ne.s32.totalorder %s3395_s15, 0 }
  0x60   : > { %p3400_p1 = scmp.eq.s32.totalorder (!%p3399_p13), %s2945_s25, 0 }
  0x61   : > { %409 = sbr.rel (%p3399_p13) target bundleno = 1953 (0x7a1), region = 68 }
  0x68   : > { %2824 = dma.done.wait (%p3400_p1), [#allocation3], 128   ;;  %p3401_p0 = pmov %p3400_p1 }
  0x6a   : > { %2826 = vsyncadd (%p3401_p0), [#allocation3], 4294967168  ;;  %p3402_p6 = pmov %p3401_p0 }
  0x6b   : > { %p3403_p5 = pmov %p3401_p0 }
  0x6c   : > { %2828 = dma.done.wait (%p3402_p6), [#allocation6], 32  }
  0x6d   : > { %2830 = vsyncadd (%p3403_p5), [#allocation6], 4294967264  ;;  %s2287_s7 = sshll.u32 %s2945_s25, 3  ;;  %v2856_v0 = vmov 0.0   ;;  %vm2857_vm0 = vmmov 0   ;;  %vm497_vm1 = vcmask 1043456  }
  0x6e   : > { %2418 = vmatprep.subr.bf16.mxu0 %v2856_v0  ;;  %2424 = vmatprep.subr.bf16.mxu1 %v2856_v0  ;;  %p465_p12 = scmp.lt.s32.totalorder %s2287_s7, 15  ;;  %vm493_vm2 = vcmask 64512   ;;  %v2686_v25 = vld [vmem:[#allocation2] sm:$0xff]   ;;  %vm875_vm3 = vcmask 130048   ;;  %vm1348_vm4 = vcmask 261120   ;;  %vm2021_vm5 = vcmask 1041409  }
  0x6f   : > { %2420 = vmatprep.mubr.msk.bf16.mxu0 %vm2857_vm0, %v2856_v0  ;;  %2426 = vmatprep.mubr.msk.bf16.mxu1 %vm2857_vm0, %v2856_v0  ;;  %v2304_v62 = vld [vmem:[%s3367_s3] ss:$0 sm:$0xff]  ;;  %vm2023_vm6 = vcmask 1042434   ;;  %vm2025_vm7 = vcmask 1043459   ;;  %vm2027_vm8 = vcmask 1044484   ;;  %vm2029_vm9 = vcmask 1045509  }
  0x70   : > { %s3415_s7 = smov (!%p465_p12, %s2287_s7), 15  ;;  %vm2031_vm10 = vcmask 1046534   ;;  %vm2033_vm11 = vcmask 1047559   ;;  %s461_s27 = sand.u32 1, %s2841_s22  }
  0x71   : > { %s2288_s15 = sshll.u32 %s3415_s7, 2  ;;  %s2286_s19 = sshll.u32 %s461_s27, 3 }
  0x72   : > { %s3075_s18 = scalar_lea.vmem %s3365_s1, %s2288_s15  ;;  %s3080_s16 = scalar_lea.vmem %s3364_s0, %s2288_s15 }
  0x73   : > { %v485_v1 = vld [vmem:[%s3075_s18] sm:$0xf]  ;;  %v486_v2 = vld [vmem:[%s3075_s18 + $0x4] sm:$0xf]  ;;  %v487_v5 = vld [vmem:[%s3075_s18 + $0x8] sm:$0xf] }
  0x74   : > { %v499_v3 = vsel %vm497_vm1, %v485_v1, 0  ;;  %v545_v4 = vsel %vm497_vm1, %v486_v2, 0  ;;  %v3088_v6 = vld [vmem:[%s3080_s16] sm:$0xf]  ;;  %v3091_v7 = vld [vmem:[%s3080_s16 + $0x4] sm:$0xf] }
  0x75   : > { %2419 = vmatpush3.bf16.msra.mxu0 %v499_v3  ;;  %2425 = vmatpush3.bf16.msra.mxu1 %v545_v4  ;;  %v488_v8 = vld [vmem:[%s3075_s18 + $0xc] sm:$0xf]  ;;  %v591_v9 = vsel %vm497_vm1, %v487_v5, 0  ;;  %v489_v11 = vld [vmem:[%s3075_s18 + $0x10] sm:$0xf]  ;;  %s2344_s7 = sshll.u32 %s2945_s25, 7 }
  0x76   : > { %2430 = vmatprep.subr.bf16.mxu0 %v2856_v0  ;;  %2436 = vmatprep.subr.bf16.mxu1 %v2856_v0  ;;  %v637_v10 = vsel %vm497_vm1, %v488_v8, 0  ;;  %v490_v12 = vld [vmem:[%s3075_s18 + $0x14] sm:$0xf]  ;;  %v683_v13 = vsel %vm497_vm1, %v489_v11, 0  ;;  %v3111_v15 = vld [vmem:[%s3080_s16 + $0x8] sm:$0xf]  ;;  %s3322_s29 = scalar_lea.hbm %s3376_s12, %s2344_s7 }
  0x77   : > { %v729_v14 = vsel %vm497_vm1, %v490_v12, 0  ;;  %v3114_v16 = vld [vmem:[%s3080_s16 + $0xc] sm:$0xf]  ;;  %v491_v17 = vld [vmem:[%s3075_s18 + $0x18] sm:$0xf]  ;;  %s463_s15 = scalar_lea.vmem [#allocation8], %s2286_s19 }
  0x78   : > { %2421 = vmatmul.mubr.msk.bf16.vlgmr.msra.gmra.mrb[0].mxu0 %vm493_vm2, %v3088_v6  ;;  %2427 = vmatmul.mubr.msk.bf16.vlgmr.msra.gmra.mrb[0].mxu1 %vm493_vm2, %v3091_v7  ;;  %v492_v18 = vld [vmem:[%s3075_s18 + $0x1c] sm:$0xf]  ;;  %v3131_v19 = vld [vmem:[%s3080_s16 + $0x10] sm:$0xf]  ;;  %v3134_v20 = vld [vmem:[%s3080_s16 + $0x14] sm:$0xf] }
  0x79   : > { %2431 = vmatpush3.bf16.msra.mxu0 %v591_v9  ;;  %2437 = vmatpush3.bf16.msra.mxu1 %v637_v10  ;;  %v775_v21 = vsel %vm497_vm1, %v491_v17, 0  ;;  %v821_v22 = vsel %vm497_vm1, %v492_v18, 0  ;;  %v3148_v23 = vld [vmem:[%s3080_s16 + $0x18] sm:$0xf]  ;;  %v3151_v24 = vld [vmem:[%s3080_s16 + $0x1c] sm:$0xf] }
  0x7a   : > { %2432 = vmatprep.mubr.msk.bf16.mxu0 %vm2857_vm0, %v2856_v0  ;;  %2438 = vmatprep.mubr.msk.bf16.mxu1 %vm2857_vm0, %v2856_v0  ;;  %s2174_s20 = sshll.u32 %s463_s15, 4  ;;  %s2161_s14 = scalar_lea.sflag [#allocation4], %s461_s27  ;;  %s3324_s20 = int_to_ptr.vmem [resolvable:$true] %s2174_s20 }
  0x7b   : > { %2442 = vmatprep.subr.bf16.mxu0 %v2856_v0  ;;  %2448 = vmatprep.subr.bf16.mxu1 %v2856_v0  ;;  %s2779_s25 = scalar_lea.vmem %s3324_s20, 128  ;;  %p3404_p10 = scmp.ne.s32.totalorder %s3392_s13, 0 }
  0x7c   : > { %p2780_p9 = scmp.ne.s32.totalorder %s3324_s20, %s2779_s25  ;;  %s2858_s16 = smov [#allocation8]  }
  0x7d   : > { %s2783_s26 = sshll.u32 %s2858_s16, 4  ;;  %s2784_s26 = int_to_ptr.vmem [resolvable:$false] %s2783_s26 }
  0x7e   : > { %p2781_p2 = pnand %p2780_p9, %p3404_p10  ;;  %s2785_s30 = scalar_lea.vmem %s2784_s26, 256 }
  0x7f   : > { %p2786_p4 = scmp.lt.s32.totalorder %s3324_s20, %s2784_s26  ;;  %p2787_p7 = scmp.lt.s32.totalorder %s2785_s30, %s2779_s25 }
  0x80   : > { %2433 = vmatmul.mubr.msk.bf16.vlgmr.msra.gmra.mrb[4].mxu0 %vm493_vm2, %v3111_v15  ;;  %2439 = vmatmul.mubr.msk.bf16.vlgmr.msra.gmra.mrb[4].mxu1 %vm493_vm2, %v3114_v16  ;;  %p2782_p3 = pneg %p2781_p2 }
  0x81   : > { %2443 = vmatpush3.bf16.msra.mxu0 %v683_v13  ;;  %2449 = vmatpush3.bf16.msra.mxu1 %v729_v14  ;;  %p2788_p8 = por %p2787_p7, %p2786_p4 }
  0x82   : > { %2444 = vmatprep.mubr.msk.bf16.mxu0 %vm2857_vm0, %v2856_v0  ;;  %2450 = vmatprep.mubr.msk.bf16.mxu1 %vm2857_vm0, %v2856_v0 }
  0x83   : > { %2454 = vmatprep.subr.bf16.mxu0 %v2856_v0  ;;  %2460 = vmatprep.subr.bf16.mxu1 %v2856_v0  ;;  %p2789_p11 = pnand %p2788_p8, %p2782_p3 }
  0x88   : > { %2445 = vmatmul.mubr.msk.bf16.vlgmr.msra.gmra.mrb[8].mxu0 %vm493_vm2, %v3131_v19  ;;  %2451 = vmatmul.mubr.msk.bf16.vlgmr.msra.gmra.mrb[8].mxu1 %vm493_vm2, %v3134_v20 }
  0x89   : > { %2455 = vmatpush3.bf16.msra.mxu0 %v775_v21  ;;  %2461 = vmatpush3.bf16.msra.mxu1 %v821_v22 }
  0x8a   : > { %2456 = vmatprep.mubr.msk.bf16.mxu0 %vm2857_vm0, %v2856_v0  ;;  %2462 = vmatprep.mubr.msk.bf16.mxu1 %vm2857_vm0, %v2856_v0 }
  0x8b   : > { %2476 = vmatprep.subr.bf16.mxu1 %v2856_v0  ;;  %2466 = vmatprep.subr.bf16.mxu0 %v2686_v25 }
  0x90   : > { %2457 = vmatmul.mubr.msk.bf16.vlgmr.msra.gmra.mrb[12].mxu0 %vm493_vm2, %v3148_v23  ;;  %2463 = vmatmul.mubr.msk.bf16.vlgmr.msra.gmra.mrb[12].mxu1 %vm493_vm2, %v3151_v24 }
  0x91   : > { %2478 = vmatprep.mubr.msk.bf16.mxu1 %vm2857_vm0, %v2856_v0  ;;  %2467 = vmatpush3.bf16.msra.mxu0 %v2686_v25 }
  0x92   : > { %2488 = vmatprep.subr.bf16.mxu0 %v2856_v0 }
 0x14b   : > { %v535_v26 = vpop.f32.mrb[0].mxu0  ;;  %v581_v27 = vpop.f32.mrb[0].mxu1 }
 0x14c   : > { %v863_v28 = vpack.c.bf16 %v581_v27, %v535_v26  ;;  %v2422_v29 = vpop.f32.mrb[1].mxu0  ;;  %v2428_v30 = vpop.f32.mrb[1].mxu1 }
 0x14d   : > { %v538_v31 = vpop.f32.mrb[2].mxu0  ;;  %v584_v32 = vpop.f32.mrb[2].mxu1 }
 0x14e   : > { %v2423_v33 = vpop.f32.mrb[3].mxu0  ;;  %v2429_v34 = vpop.f32.mrb[3].mxu1  ;;  %2468 = vmatprep.mubr.msk.bf16.mxu0 %vm875_vm3, %v863_v28 }
 0x153   : > { %v627_v35 = vpop.f32.mrb[4].mxu0  ;;  %v673_v36 = vpop.f32.mrb[4].mxu1 }
 0x154   : > { %v864_v37 = vpack.c.bf16 %v673_v36, %v627_v35  ;;  %v2434_v38 = vpop.f32.mrb[5].mxu0  ;;  %v2440_v39 = vpop.f32.mrb[5].mxu1 }
 0x155   : > { %v630_v40 = vpop.f32.mrb[6].mxu0  ;;  %v676_v41 = vpop.f32.mrb[6].mxu1 }
 0x156   : > { %v2435_v42 = vpop.f32.mrb[7].mxu0  ;;  %v2441_v43 = vpop.f32.mrb[7].mxu1  ;;  %2469 = vmatmul.mubr.msk.bf16.vlgmr.msra.gmra.mrb[16].mxu0 %vm875_vm3, %v864_v37 }
 0x15b   : > { %v719_v44 = vpop.f32.mrb[8].mxu0  ;;  %v765_v45 = vpop.f32.mrb[8].mxu1 }
 0x15c   : > { %v865_v46 = vpack.c.bf16 %v765_v45, %v719_v44  ;;  %v2446_v47 = vpop.f32.mrb[9].mxu0  ;;  %v2452_v48 = vpop.f32.mrb[9].mxu1 }
 0x15d   : > { %v722_v49 = vpop.f32.mrb[10].mxu0  ;;  %v768_v50 = vpop.f32.mrb[10].mxu1  ;;  %v2687_v48 = vld [vmem:[%s3368_s4] sm:$0xff]  }
 0x15e   : > { %v2447_v51 = vpop.f32.mrb[11].mxu0  ;;  %v2453_v52 = vpop.f32.mrb[11].mxu1  ;;  %2472 = vmatprep.mubr.msk.bf16.mxu0 %vm875_vm3, %v865_v46  ;;  %v2688_v49 = vld [vmem:[%s3368_s4 + $0x8] sm:$0xff]  }
 0x163   : > { %v811_v53 = vpop.f32.mrb[12].mxu0  ;;  %v857_v54 = vpop.f32.mrb[12].mxu1 }
 0x164   : > { %v866_v55 = vpack.c.bf16 %v857_v54, %v811_v53  ;;  %v2458_v56 = vpop.f32.mrb[13].mxu0  ;;  %v2464_v57 = vpop.f32.mrb[13].mxu1 }
 0x165   : > { %v814_v58 = vpop.f32.mrb[14].mxu0  ;;  %v860_v59 = vpop.f32.mrb[14].mxu1 }
 0x166   : > { %2473 = vmatmul.mubr.msk.bf16.gmra.mrb[20].mxu0 %vm875_vm3, %v866_v55  ;;  %v2459_v60 = vpop.f32.mrb[15].mxu0  ;;  %v2465_v61 = vpop.f32.mrb[15].mxu1 }
 0x167   : > { %2490 = vmatprep.mubr.msk.bf16.mxu0 %vm2857_vm0, %v2856_v0 }
 0x229   : > { %v2470_v63 = vpop.f32.mrb[16].mxu0 }
 0x22a   : > { %v962_v1 = vadd.f32 %v2470_v63, %v2304_v62  ;;  %v922_v2 = vpop.f32.mrb[17].mxu0 }
 0x22b   : > { %v960_v3 = vadd.f32 %v2304_v62, %v922_v2  ;;  %v2471_v4 = vpop.f32.mrb[18].mxu0 }
 0x22c   : > { %v970_v5 = vmax.f32 %v962_v1, 0.0  ;;  %v925_v8 = vpop.f32.mrb[19].mxu0  ;;  %v963_v17 = vadd.f32 %v2471_v4, %v2304_v62 }
 0x22d   : > { %v968_v9 = vmax.f32 %v960_v3, 0.0  ;;  %v961_v10 = vadd.f32 %v2304_v62, %v925_v8 }
 0x22e   : > { %v978_v11 = vpack.c.bf16 %v970_v5, %v970_v5  ;;  %v971_v22 = vmax.f32 %v963_v17, 0.0 }
 0x22f   : > { %v976_v12 = vpack.c.bf16 %v968_v9, %v968_v9  ;;  %v969_v13 = vmax.f32 %v961_v10, 0.0 }
 0x230   : > { %v1071_v14 = vsel %vm497_vm1, %v978_v11, 0  ;;  %v979_v26 = vpack.c.bf16 %v971_v22, %v971_v22 }
 0x231   : > { %v977_v18 = vpack.c.bf16 %v969_v13, %v969_v13  ;;  %2489 = vmatpush3.bf16.msra.mxu0 %v1071_v14  ;;  %v985_v21 = vsel %vm497_vm1, %v976_v12, 0 }
 0x232   : > { %2477 = vmatpush3.bf16.msra.mxu1 %v985_v21  ;;  %2500 = vmatprep.subr.bf16.mxu0 %v2856_v0  ;;  %v1114_v34 = vsel %vm497_vm1, %v979_v26, 0 }
 0x233   : > { %2482 = vmatprep.subr.bf16.mxu1 %v2856_v0  ;;  %v1028_v25 = vsel %vm497_vm1, %v977_v18, 0 }
 0x234   : > { %2491 = vmatmul.mubr.msk.bf16.vlgmr.msra.gmra.mrb[24].mxu0 %vm493_vm2, %v3111_v15 }
 0x235   : > { %2479 = vmatmul.mubr.msk.bf16.vlgmr.msra.gmra.mrb[16].mxu1 %vm493_vm2, %v3088_v6  ;;  %2502 = vmatprep.mubr.msk.bf16.mxu0 %vm2857_vm0, %v2856_v0 }
 0x236   : > { %2483 = vmatpush3.bf16.msra.mxu1 %v1028_v25  ;;  %2484 = vmatprep.mubr.msk.bf16.mxu1 %vm2857_vm0, %v2856_v0 }
 0x237   : > { %2494 = vmatprep.subr.bf16.mxu1 %v2856_v0 }
 0x239   : > { %v2474_v27 = vpop.f32.mrb[20].mxu0 }
 0x23a   : > { %v966_v28 = vadd.f32 %v2474_v27, %v2304_v62  ;;  %v938_v29 = vpop.f32.mrb[21].mxu0 }
 0x23b   : > { %v964_v30 = vadd.f32 %v2304_v62, %v938_v29  ;;  %v2475_v31 = vpop.f32.mrb[22].mxu0 }
 0x23c   : > { %v974_v32 = vmax.f32 %v966_v28, 0.0  ;;  %v941_v33 = vpop.f32.mrb[23].mxu0  ;;  %v967_v38 = vadd.f32 %v2475_v31, %v2304_v62  ;;  %v2319_v31 = vld [vmem:[%s3369_s5] ss:$0 sm:$0xff] }
 0x23d   : > { %2485 = vmatmul.mubr.msk.bf16.vlgmr.msra.gmra.mrb[20].mxu1 %vm493_vm2, %v3091_v7  ;;  %v972_v35 = vmax.f32 %v964_v30, 0.0  ;;  %v965_v36 = vadd.f32 %v2304_v62, %v941_v33 }
 0x23e   : > { %2495 = vmatpush3.bf16.msra.mxu1 %v1114_v34  ;;  %2496 = vmatprep.mubr.msk.bf16.mxu1 %vm2857_vm0, %v2856_v0  ;;  %v982_v40 = vpack.c.bf16 %v974_v32, %v974_v32  ;;  %v975_v43 = vmax.f32 %v967_v38, 0.0 }
 0x23f   : > { %v980_v37 = vpack.c.bf16 %v972_v35, %v972_v35  ;;  %v973_v39 = vmax.f32 %v965_v36, 0.0  ;;  %2506 = vmatprep.subr.bf16.mxu1 %v2856_v0 }
 0x240   : > { %v1243_v45 = vsel %vm497_vm1, %v982_v40, 0  ;;  %v983_v46 = vpack.c.bf16 %v975_v43, %v975_v43 }
 0x241   : > { %v981_v41 = vpack.c.bf16 %v973_v39, %v973_v39  ;;  %v1157_v42 = vsel %vm497_vm1, %v980_v37, 0 }
 0x242   : > { %2501 = vmatpush3.bf16.msra.mxu0 %v1157_v42  ;;  %v1286_v47 = vsel %vm497_vm1, %v983_v46, 0 }
 0x243   : > { %v1200_v44 = vsel %vm497_vm1, %v981_v41, 0  ;;  %2512 = vmatprep.subr.bf16.mxu0 %v2856_v0 }
 0x245   : > { %2497 = vmatmul.mubr.msk.bf16.vlgmr.msra.gmra.mrb[24].mxu1 %vm493_vm2, %v3114_v16  ;;  %2503 = vmatmul.mubr.msk.bf16.vlgmr.msra.gmra.mrb[28].mxu0 %vm493_vm2, %v3131_v19 }
 0x246   : > { %2507 = vmatpush3.bf16.msra.mxu1 %v1200_v44  ;;  %2508 = vmatprep.mubr.msk.bf16.mxu1 %vm2857_vm0, %v2856_v0 }
 0x247   : > { %2518 = vmatprep.subr.bf16.mxu1 %v2856_v0  ;;  %2513 = vmatpush3.bf16.msra.mxu0 %v1243_v45 }
 0x248   : > { %2514 = vmatprep.mubr.msk.bf16.mxu0 %vm2857_vm0, %v2856_v0  ;;  %2524 = vmatprep.subr.bf16.mxu0 %v2687_v48 }
 0x24d   : > { %2509 = vmatmul.mubr.msk.bf16.vlgmr.msra.gmra.mrb[28].mxu1 %vm493_vm2, %v3134_v20  ;;  %2515 = vmatmul.mubr.msk.bf16.vlgmr.msra.gmra.mrb[32].mxu0 %vm493_vm2, %v3148_v23 }
 0x24e   : > { %2519 = vmatpush3.bf16.msra.mxu1 %v1286_v47  ;;  %2520 = vmatprep.mubr.msk.bf16.mxu1 %vm2857_vm0, %v2856_v0 }
 0x24f   : > { %2536 = vmatprep.subr.bf16.mxu1 %v2856_v0  ;;  %2525 = vmatpush3.bf16.msra.mxu0 %v2687_v48 }
 0x250   : > { %2526 = vmatprep.subr.bf16.mxu0 %v2688_v49 }
 0x253   : > { %2527 = vmatpush3.bf16.msra.mxu0 %v2688_v49 }
 0x254   : > { %2548 = vmatprep.subr.bf16.mxu0 %v2856_v0 }
 0x255   : > { %2521 = vmatmul.mubr.msk.bf16.vlgmr.msra.gmra.mrb[32].mxu1 %vm493_vm2, %v3151_v24 }
 0x256   : > { %2538 = vmatprep.mubr.msk.bf16.mxu1 %vm2857_vm0, %v2856_v0 }
 0x307   : > { %v1107_v50 = vpop.f32.mrb[24].mxu0 }
 0x308   : > { %v1021_v51 = vpop.f32.mrb[16].mxu1  ;;  %v2492_v52 = vpop.f32.mrb[25].mxu0 }
 0x309   : > { %v2480_v53 = vpop.f32.mrb[17].mxu1  ;;  %v1110_v54 = vpop.f32.mrb[26].mxu0 }
 0x30a   : > { %v1024_v55 = vpop.f32.mrb[18].mxu1  ;;  %v2493_v56 = vpop.f32.mrb[27].mxu0 }
 0x30b   : > { %v2481_v57 = vpop.f32.mrb[19].mxu1 }
 0x310   : > { %v1064_v58 = vpop.f32.mrb[20].mxu1 }
 0x311   : > { %v1328_v59 = vpack.c.bf16 %v1064_v58, %v1021_v51  ;;  %v2486_v60 = vpop.f32.mrb[21].mxu1 }
 0x312   : > { %v1067_v61 = vpop.f32.mrb[22].mxu1 }
 0x313   : > { %v2487_v62 = vpop.f32.mrb[23].mxu1  ;;  %2528 = vmatprep.mubr.msk.bf16.mxu0 %vm1348_vm4, %v1328_v59 }
 0x318   : > { %v1150_v63 = vpop.f32.mrb[24].mxu1  ;;  %v1193_v1 = vpop.f32.mrb[28].mxu0 }
 0x319   : > { %v1329_v2 = vpack.c.bf16 %v1150_v63, %v1107_v50  ;;  %v2498_v3 = vpop.f32.mrb[25].mxu1  ;;  %v2504_v4 = vpop.f32.mrb[29].mxu0 }
 0x31a   : > { %v1153_v5 = vpop.f32.mrb[26].mxu1  ;;  %v1196_v8 = vpop.f32.mrb[30].mxu0 }
 0x31b   : > { %v2499_v9 = vpop.f32.mrb[27].mxu1  ;;  %2529 = vmatmul.mubr.msk.bf16.vlgmr.msra.gmra.mrb[36].mxu0 %vm1348_vm4, %v1329_v2  ;;  %v2505_v10 = vpop.f32.mrb[31].mxu0 }
 0x320   : > { %v1236_v11 = vpop.f32.mrb[28].mxu1  ;;  %v1279_v12 = vpop.f32.mrb[32].mxu0 }
 0x321   : > { %v1330_v13 = vpack.c.bf16 %v1236_v11, %v1193_v1  ;;  %v2510_v14 = vpop.f32.mrb[29].mxu1  ;;  %v2516_v17 = vpop.f32.mrb[33].mxu0 }
 0x322   : > { %v1239_v18 = vpop.f32.mrb[30].mxu1  ;;  %v1282_v21 = vpop.f32.mrb[34].mxu0 }
 0x323   : > { %v2511_v22 = vpop.f32.mrb[31].mxu1  ;;  %2532 = vmatprep.mubr.msk.bf16.mxu0 %vm1348_vm4, %v1330_v13  ;;  %v2517_v25 = vpop.f32.mrb[35].mxu0 }
 0x328   : > { %v1322_v26 = vpop.f32.mrb[32].mxu1 }
 0x329   : > { %v1331_v27 = vpack.c.bf16 %v1322_v26, %v1279_v12  ;;  %v2522_v28 = vpop.f32.mrb[33].mxu1 }
 0x32a   : > { %v1325_v29 = vpop.f32.mrb[34].mxu1 }
 0x32b   : > { %2533 = vmatmul.mubr.msk.bf16.gmra.mrb[40].mxu0 %vm1348_vm4, %v1331_v27  ;;  %v2523_v30 = vpop.f32.mrb[35].mxu1 }
 0x32c   : > { %2550 = vmatprep.mubr.msk.bf16.mxu0 %vm2857_vm0, %v2856_v0 }
 0x3ee   : > { %v2530_v32 = vpop.f32.mrb[36].mxu0 }
 0x3ef   : > { %v1435_v33 = vadd.f32 %v2530_v32, %v2319_v31  ;;  %v1395_v34 = vpop.f32.mrb[37].mxu0 }
 0x3f0   : > { %v1433_v35 = vadd.f32 %v2319_v31, %v1395_v34  ;;  %v2531_v36 = vpop.f32.mrb[38].mxu0 }
 0x3f1   : > { %v1443_v37 = vmax.f32 %v1435_v33, 0.0  ;;  %v1398_v38 = vpop.f32.mrb[39].mxu0  ;;  %v1436_v45 = vadd.f32 %v2531_v36, %v2319_v31 }
 0x3f2   : > { %v1441_v39 = vmax.f32 %v1433_v35, 0.0  ;;  %v1434_v40 = vadd.f32 %v2319_v31, %v1398_v38 }
 0x3f3   : > { %v1451_v41 = vpack.c.bf16 %v1443_v37, %v1443_v37  ;;  %v1444_v48 = vmax.f32 %v1436_v45, 0.0 }
 0x3f4   : > { %v1449_v42 = vpack.c.bf16 %v1441_v39, %v1441_v39  ;;  %v1442_v43 = vmax.f32 %v1434_v40, 0.0 }
 0x3f5   : > { %v1544_v44 = vsel %vm497_vm1, %v1451_v41, 0  ;;  %v1452_v50 = vpack.c.bf16 %v1444_v48, %v1444_v48  ;;  %v2692_v48 = vld [vmem:[%s3372_s8 + $0x8] sm:$0xff]  }
 0x3f6   : > { %v1450_v46 = vpack.c.bf16 %v1442_v43, %v1442_v43  ;;  %2549 = vmatpush3.bf16.msra.mxu0 %v1544_v44  ;;  %v1458_v47 = vsel %vm497_vm1, %v1449_v42, 0 }
 0x3f7   : > { %2537 = vmatpush3.bf16.msra.mxu1 %v1458_v47  ;;  %2560 = vmatprep.subr.bf16.mxu0 %v2856_v0  ;;  %v1587_v57 = vsel %vm497_vm1, %v1452_v50, 0  ;;  %v2691_v47 = vld [vmem:[%s3372_s8] sm:$0xff]  }
 0x3f8   : > { %2542 = vmatprep.subr.bf16.mxu1 %v2856_v0  ;;  %v1501_v49 = vsel %vm497_vm1, %v1450_v46, 0 }
 0x3f9   : > { %2551 = vmatmul.mubr.msk.bf16.vlgmr.msra.gmra.mrb[44].mxu0 %vm493_vm2, %v3111_v15 }
 0x3fa   : > { %2539 = vmatmul.mubr.msk.bf16.vlgmr.msra.gmra.mrb[36].mxu1 %vm493_vm2, %v3088_v6  ;;  %2562 = vmatprep.mubr.msk.bf16.mxu0 %vm2857_vm0, %v2856_v0 }
 0x3fb   : > { %2543 = vmatpush3.bf16.msra.mxu1 %v1501_v49  ;;  %2544 = vmatprep.mubr.msk.bf16.mxu1 %vm2857_vm0, %v2856_v0  ;;  %v2334_v49 = vld [vmem:[#allocation5] ss:$0 sm:$0xff] }
 0x3fc   : > { %2554 = vmatprep.subr.bf16.mxu1 %v2856_v0 }
 0x3fe   : > { %v2534_v51 = vpop.f32.mrb[40].mxu0 }
 0x3ff   : > { %v1439_v52 = vadd.f32 %v2534_v51, %v2319_v31  ;;  %v1411_v53 = vpop.f32.mrb[41].mxu0 }
 0x400   : > { %v1437_v15 = vadd.f32 %v2319_v31, %v1411_v53  ;;  %v2535_v54 = vpop.f32.mrb[42].mxu0 }
 0x401   : > { %v1447_v55 = vmax.f32 %v1439_v52, 0.0  ;;  %v1414_v56 = vpop.f32.mrb[43].mxu0  ;;  %v1440_v62 = vadd.f32 %v2535_v54, %v2319_v31 }
 0x402   : > { %v1445_v6 = vmax.f32 %v1437_v15, 0.0  ;;  %2545 = vmatmul.mubr.msk.bf16.vlgmr.msra.gmra.mrb[40].mxu1 %vm493_vm2, %v3091_v7  ;;  %v1438_v58 = vadd.f32 %v2319_v31, %v1414_v56 }
 0x403   : > { %2555 = vmatpush3.bf16.msra.mxu1 %v1587_v57  ;;  %2556 = vmatprep.mubr.msk.bf16.mxu1 %vm2857_vm0, %v2856_v0  ;;  %v1455_v59 = vpack.c.bf16 %v1447_v55, %v1447_v55  ;;  %v1448_v3 = vmax.f32 %v1440_v62, 0.0 }
 0x404   : > { %v1453_v60 = vpack.c.bf16 %v1445_v6, %v1445_v6  ;;  %v1446_v61 = vmax.f32 %v1438_v58, 0.0  ;;  %2566 = vmatprep.subr.bf16.mxu1 %v2856_v0 }
 0x405   : > { %v1716_v2 = vsel %vm497_vm1, %v1455_v59, 0  ;;  %v1456_v4 = vpack.c.bf16 %v1448_v3, %v1448_v3 }
 0x406   : > { %v1454_v63 = vpack.c.bf16 %v1446_v61, %v1446_v61  ;;  %v1630_v1 = vsel %vm497_vm1, %v1453_v60, 0 }
 0x407   : > { %2561 = vmatpush3.bf16.msra.mxu0 %v1630_v1  ;;  %v1759_v5 = vsel %vm497_vm1, %v1456_v4, 0 }
 0x408   : > { %2572 = vmatprep.subr.bf16.mxu0 %v2856_v0  ;;  %v1673_v7 = vsel %vm497_vm1, %v1454_v63, 0 }
 0x40a   : > { %2557 = vmatmul.mubr.msk.bf16.vlgmr.msra.gmra.mrb[44].mxu1 %vm493_vm2, %v3114_v16  ;;  %2563 = vmatmul.mubr.msk.bf16.vlgmr.msra.gmra.mrb[48].mxu0 %vm493_vm2, %v3131_v19  ;;  %v2689_v16 = vld [vmem:[%s3370_s6] sm:$0xff]   ;;  %v2690_v19 = vld [vmem:[%s3370_s6 + $0x8] sm:$0xff]  }
 0x40b   : > { %2567 = vmatpush3.bf16.msra.mxu1 %v1673_v7  ;;  %2573 = vmatpush3.bf16.msra.mxu0 %v1716_v2 }
 0x40c   : > { %2568 = vmatprep.mubr.msk.bf16.mxu1 %vm2857_vm0, %v2856_v0  ;;  %2578 = vmatprep.subr.bf16.mxu1 %v2856_v0 }
 0x40d   : > { %2574 = vmatprep.mubr.msk.bf16.mxu0 %vm2857_vm0, %v2856_v0  ;;  %2584 = vmatprep.subr.bf16.mxu0 %v2689_v16 }
 0x412   : > { %2569 = vmatmul.mubr.msk.bf16.vlgmr.msra.gmra.mrb[48].mxu1 %vm493_vm2, %v3134_v20  ;;  %2575 = vmatmul.mubr.msk.bf16.vlgmr.msra.gmra.mrb[52].mxu0 %vm493_vm2, %v3148_v23 }
 0x413   : > { %2579 = vmatpush3.bf16.msra.mxu1 %v1759_v5  ;;  %2580 = vmatprep.mubr.msk.bf16.mxu1 %vm2857_vm0, %v2856_v0 }
 0x414   : > { %2596 = vmatprep.subr.bf16.mxu1 %v2856_v0  ;;  %2585 = vmatpush3.bf16.msra.mxu0 %v2689_v16 }
 0x415   : > { %2586 = vmatprep.subr.bf16.mxu0 %v2690_v19 }
 0x418   : > { %2587 = vmatpush3.bf16.msra.mxu0 %v2690_v19 }
 0x41a   : > { %2581 = vmatmul.mubr.msk.bf16.vlgmr.msra.gmra.mrb[52].mxu1 %vm493_vm2, %v3151_v24 }
 0x41b   : > { %2600 = vmatprep.mubr.msk.bf16.mxu1 %vm2857_vm0, %v2856_v0  ;;  %2597 = vmatpush3.bf16.msra.mxu1 %v2691_v47 }
 0x41c   : > { %2598 = vmatprep.subr.bf16.mxu1 %v2856_v0 }
 0x41f   : > { %2599 = vmatpush3.bf16.msra.mxu1 %v2692_v48 }
 0x420   : > { %2604 = vmatprep.subr.bf16.mxu1 %v2856_v0 }
 0x4cc   : > { %v1580_v20 = vpop.f32.mrb[44].mxu0 }
 0x4cd   : > { %v1494_v23 = vpop.f32.mrb[36].mxu1  ;;  %v2552_v8 = vpop.f32.mrb[45].mxu0 }
 0x4ce   : > { %v2540_v9 = vpop.f32.mrb[37].mxu1  ;;  %v1583_v24 = vpop.f32.mrb[46].mxu0 }
 0x4cf   : > { %v1497_v10 = vpop.f32.mrb[38].mxu1  ;;  %v2553_v11 = vpop.f32.mrb[47].mxu0 }
 0x4d0   : > { %v2541_v12 = vpop.f32.mrb[39].mxu1 }
 0x4d5   : > { %v1537_v13 = vpop.f32.mrb[40].mxu1 }
 0x4d6   : > { %v1801_v14 = vpack.c.bf16 %v1537_v13, %v1494_v23  ;;  %v2546_v17 = vpop.f32.mrb[41].mxu1 }
 0x4d7   : > { %v1540_v18 = vpop.f32.mrb[42].mxu1 }
 0x4d8   : > { %2588 = vmatprep.mubr.msk.bf16.mxu0 %vm1348_vm4, %v1801_v14  ;;  %v2547_v21 = vpop.f32.mrb[43].mxu1 }
 0x4dd   : > { %v1623_v22 = vpop.f32.mrb[44].mxu1  ;;  %v1666_v25 = vpop.f32.mrb[48].mxu0 }
 0x4de   : > { %v1802_v26 = vpack.c.bf16 %v1623_v22, %v1580_v20  ;;  %v2558_v27 = vpop.f32.mrb[45].mxu1  ;;  %v2564_v28 = vpop.f32.mrb[49].mxu0 }
 0x4df   : > { %v1626_v29 = vpop.f32.mrb[46].mxu1  ;;  %v1669_v30 = vpop.f32.mrb[50].mxu0 }
 0x4e0   : > { %2589 = vmatmul.mubr.msk.bf16.vlgmr.msra.gmra.mrb[56].mxu0 %vm1348_vm4, %v1802_v26  ;;  %v2559_v31 = vpop.f32.mrb[47].mxu1  ;;  %v2565_v32 = vpop.f32.mrb[51].mxu0 }
 0x4e5   : > { %v1709_v33 = vpop.f32.mrb[48].mxu1  ;;  %v1752_v34 = vpop.f32.mrb[52].mxu0 }
 0x4e6   : > { %v1803_v35 = vpack.c.bf16 %v1709_v33, %v1666_v25  ;;  %v2570_v36 = vpop.f32.mrb[49].mxu1  ;;  %v2576_v37 = vpop.f32.mrb[53].mxu0 }
 0x4e7   : > { %v1712_v38 = vpop.f32.mrb[50].mxu1  ;;  %v1755_v39 = vpop.f32.mrb[54].mxu0 }
 0x4e8   : > { %v2571_v40 = vpop.f32.mrb[51].mxu1  ;;  %2592 = vmatprep.mubr.msk.bf16.mxu0 %vm1348_vm4, %v1803_v35  ;;  %v2577_v41 = vpop.f32.mrb[55].mxu0 }
 0x4ed   : > { %v1795_v42 = vpop.f32.mrb[52].mxu1 }
 0x4ee   : > { %v1804_v43 = vpack.c.bf16 %v1795_v42, %v1752_v34  ;;  %v2582_v44 = vpop.f32.mrb[53].mxu1 }
 0x4ef   : > { %v1798_v45 = vpop.f32.mrb[54].mxu1 }
 0x4f0   : > { %2593 = vmatmul.mubr.msk.bf16.gmra.mrb[60].mxu0 %vm1348_vm4, %v1804_v43  ;;  %v2583_v46 = vpop.f32.mrb[55].mxu1 }
 0x5b3   : > { %v2590_v50 = vpop.f32.mrb[56].mxu0 }
 0x5b4   : > { %v1907_v51 = vadd.f32 %v2590_v50, %v2334_v49  ;;  %v1867_v52 = vpop.f32.mrb[57].mxu0 }
 0x5b5   : > { %v1905_v53 = vadd.f32 %v2334_v49, %v1867_v52  ;;  %v2591_v15 = vpop.f32.mrb[58].mxu0 }
 0x5b6   : > { %v1915_v54 = vmax.f32 %v1907_v51, 0.0  ;;  %v1908_v55 = vadd.f32 %v2591_v15, %v2334_v49  ;;  %v1870_v56 = vpop.f32.mrb[59].mxu0 }
 0x5b7   : > { %v1913_v6 = vmax.f32 %v1905_v53, 0.0  ;;  %v1906_v57 = vadd.f32 %v2334_v49, %v1870_v56 }
 0x5b8   : > { %v1935_v58 = vsel %vm1348_vm4, %v1915_v54, 0.0  ;;  %v1916_v59 = vmax.f32 %v1908_v55, 0.0 }
 0x5b9   : > { %v1936_v60 = vrot.slane %v1935_v58, 4  ;;  %v1921_v61 = vsel %vm1348_vm4, %v1913_v6, 0.0  ;;  %v1914_v62 = vmax.f32 %v1906_v57, 0.0 }
 0x5ba   : > { %v1922_v63 = vrot.slane %v1921_v61, 4  ;;  %v1942_v1 = vsel %vm1348_vm4, %v1916_v59, 0.0 }
 0x5bb   : > { %v1937_v7 = vadd.f32 %v1936_v60, %v1935_v58  ;;  %v1943_v2 = vrot.slane %v1942_v1, 4  ;;  %v1928_v3 = vsel %vm1348_vm4, %v1914_v62, 0.0 }
 0x5bc   : > { %v1923_v4 = vadd.f32 %v1922_v63, %v1921_v61  ;;  %v1929_v5 = vrot.slane %v1928_v3, 4 }
 0x5bd   : > { %v1938_v16 = vrot.slane %v1937_v7, 2  ;;  %v1944_v19 = vadd.f32 %v1943_v2, %v1942_v1 }
 0x5be   : > { %v1924_v20 = vrot.slane %v1923_v4, 2  ;;  %v1930_v23 = vadd.f32 %v1929_v5, %v1928_v3 }
 0x5bf   : > { %v1939_v8 = vadd.f32 %v1938_v16, %v1937_v7  ;;  %v1945_v9 = vrot.slane %v1944_v19, 2 }
 0x5c0   : > { %v1925_v24 = vadd.f32 %v1924_v20, %v1923_v4  ;;  %v1931_v10 = vrot.slane %v1930_v23, 2 }
 0x5c1   : > { %v1940_v11 = vrot.slane %v1939_v8, 1  ;;  %v1946_v12 = vadd.f32 %v1945_v9, %v1944_v19 }
 0x5c2   : > { %v1926_v13 = vrot.slane %v1925_v24, 1  ;;  %v1932_v14 = vadd.f32 %v1931_v10, %v1930_v23 }
 0x5c3   : > { %v1941_v17 = vadd.f32 %v1940_v11, %v1939_v8  ;;  %v1947_v18 = vrot.slane %v1946_v12, 1  ;;  %v2594_v21 = vpop.f32.mrb[60].mxu0 }
 0x5c4   : > { %v1927_v22 = vadd.f32 %v1926_v13, %v1925_v24  ;;  %v1933_v25 = vrot.slane %v1932_v14, 1  ;;  %v1911_v26 = vadd.f32 %v2594_v21, %v2334_v49  ;;  %v1883_v27 = vpop.f32.mrb[61].mxu0 }
 0x5c5   : > { %v1980_v28 = vmul.f32 0.125, %v1941_v17  ;;  %v1948_v29 = vadd.f32 %v1947_v18, %v1946_v12  ;;  %v1909_v30 = vadd.f32 %v2334_v49, %v1883_v27  ;;  %v2595_v31 = vpop.f32.mrb[62].mxu0 }
 0x5c6   : > { %v1978_v32 = vmul.f32 0.125, %v1927_v22  ;;  %v1934_v33 = vadd.f32 %v1933_v25, %v1932_v14  ;;  %v1919_v34 = vmax.f32 %v1911_v26, 0.0  ;;  %v1912_v35 = vadd.f32 %v2595_v31, %v2334_v49  ;;  %v1886_v36 = vpop.f32.mrb[63].mxu0 }
 0x5c7   : > { %v1981_v37 = vmul.f32 0.125, %v1948_v29  ;;  %v1917_v38 = vmax.f32 %v1909_v30, 0.0  ;;  %v1910_v39 = vadd.f32 %v2334_v49, %v1886_v36  ;;  %v1988_v44 = vpack.c.bf16 %v1980_v28, %v1980_v28  ;;  %v2693_v36 = vld [vmem:[%s3374_s10] sm:$0xff]  }
 0x5c8   : > { %v1986_v40 = vpack.c.bf16 %v1978_v32, %v1978_v32  ;;  %v1979_v41 = vmul.f32 0.125, %v1934_v33  ;;  %v1963_v42 = vsel %vm1348_vm4, %v1919_v34, 0.0  ;;  %v1920_v43 = vmax.f32 %v1912_v35, 0.0 }
 0x5c9   : > { %v1964_v45 = vrot.slane %v1963_v42, 4  ;;  %v1949_v46 = vsel %vm1348_vm4, %v1917_v38, 0.0  ;;  %v1989_v47 = vpack.c.bf16 %v1981_v37, %v1981_v37  ;;  %v1918_v15 = vmax.f32 %v1910_v39, 0.0  ;;  %v2694_v37 = vld [vmem:[%s3374_s10 + $0x8] sm:$0xff]  }
 0x5ca   : > { %v1987_v48 = vpack.c.bf16 %v1979_v41, %v1979_v41  ;;  %v1950_v50 = vrot.slane %v1949_v46, 4  ;;  %v1970_v51 = vsel %vm1348_vm4, %v1920_v43, 0.0  ;;  %v2013_v49 = vunpack.c.l.b16 %v1986_v40  ;;  %v2335_v38 = vld [vmem:[#allocation7] ss:$0 sm:$0xff] }
 0x5cb   : > { %v1965_v52 = vadd.f32 %v1964_v45, %v1963_v42  ;;  %v1971_v53 = vrot.slane %v1970_v51, 4  ;;  %v2015_v56 = vunpack.c.l.b16 %v1988_v44  ;;  %v1956_v58 = vsel %vm1348_vm4, %v1918_v15, 0.0 }
 0x5cc   : > { %v2014_v54 = vunpack.c.l.b16 %v1987_v48  ;;  %v1951_v55 = vadd.f32 %v1950_v50, %v1949_v46  ;;  %v2016_v59 = vunpack.c.l.b16 %v1989_v47  ;;  %v1957_v62 = vrot.slane %v1956_v58, 4 }
 0x5cd   : > { %v1966_v6 = vrot.slane %v1965_v52, 2  ;;  %v1972_v57 = vadd.f32 %v1971_v53, %v1970_v51 }
 0x5ce   : > { %v2022_v60 = vsel %vm2021_vm5, %v2014_v54, %v2013_v49  ;;  %v1952_v61 = vrot.slane %v1951_v55, 2  ;;  %v1958_v4 = vadd.f32 %v1957_v62, %v1956_v58 }
 0x5cf   : > { %v2024_v63 = vsel %vm2023_vm6, %v2015_v56, %v2022_v60  ;;  %v1967_v1 = vadd.f32 %v1966_v6, %v1965_v52  ;;  %v1973_v7 = vrot.slane %v1972_v57, 2 }
 0x5d0   : > { %v1953_v2 = vadd.f32 %v1952_v61, %v1951_v55  ;;  %v2026_v3 = vsel %vm2025_vm7, %v2016_v59, %v2024_v63  ;;  %v1959_v20 = vrot.slane %v1958_v4, 2 }
 0x5d1   : > { %v1968_v5 = vrot.slane %v1967_v1, 1  ;;  %v1974_v16 = vadd.f32 %v1973_v7, %v1972_v57 }
 0x5d2   : > { %v1954_v19 = vrot.slane %v1953_v2, 1  ;;  %v1960_v24 = vadd.f32 %v1959_v20, %v1958_v4 }
 0x5d3   : > { %v1969_v23 = vadd.f32 %v1968_v5, %v1967_v1  ;;  %v1975_v8 = vrot.slane %v1974_v16, 1 }
 0x5d4   : > { %v1955_v9 = vadd.f32 %v1954_v19, %v1953_v2  ;;  %v1961_v12 = vrot.slane %v1960_v24, 1 }
 0x5d5   : > { %v1976_v10 = vadd.f32 %v1975_v8, %v1974_v16  ;;  %v1984_v13 = vmul.f32 0.125, %v1969_v23 }
 0x5d6   : > { %v1982_v11 = vmul.f32 0.125, %v1955_v9  ;;  %v1962_v18 = vadd.f32 %v1961_v12, %v1960_v24 }
 0x5d7   : > { %v1985_v17 = vmul.f32 0.125, %v1976_v10  ;;  %v1992_v25 = vpack.c.bf16 %v1984_v13, %v1984_v13 }
 0x5d8   : > { %v1990_v14 = vpack.c.bf16 %v1982_v11, %v1982_v11  ;;  %v1983_v22 = vmul.f32 0.125, %v1962_v18 }
 0x5d9   : > { %v1993_v27 = vpack.c.bf16 %v1985_v17, %v1985_v17  ;;  %v2019_v30 = vunpack.c.l.b16 %v1992_v25 }
 0x5da   : > { %v2017_v21 = vunpack.c.l.b16 %v1990_v14  ;;  %v1991_v28 = vpack.c.bf16 %v1983_v22, %v1983_v22 }
 0x5db   : > { %v2020_v31 = vunpack.c.l.b16 %v1993_v27 }
 0x5dc   : > { %v2028_v26 = vsel %vm2027_vm8, %v2017_v21, %v2026_v3  ;;  %v2018_v29 = vunpack.c.l.b16 %v1991_v28 }
 0x5de   : > { %v2030_v32 = vsel %vm2029_vm9, %v2018_v29, %v2028_v26 }
 0x5df   : > { %v2032_v33 = vsel %vm2031_vm10, %v2019_v30, %v2030_v32 }
 0x5e0   : > { %v2034_v34 = vsel %vm2033_vm11, %v2020_v31, %v2032_v33 }
 0x5e1   : > { %v2035_v35 = vpack.c.b16 %v2034_v34, %v2034_v34 }
 0x5e3   : > { %2601 = vmatmul.mubr.msk.bf16.vlgmr.msra.gmra.mrb[56].mxu1 %vm1348_vm4, %v2035_v35 }
 0x5e4   : > { %2608 = vmatprep.mubr.msk.bf16.mxu1 %vm2857_vm0, %v2856_v0  ;;  %2605 = vmatpush3.bf16.msra.mxu1 %v2693_v36 }
 0x5e5   : > { %2606 = vmatprep.subr.bf16.mxu1 %v2856_v0  ;;  %v2339_v0 = vld [vmem:[%s3375_s11] ss:$0 sm:$0xff] }
 0x5e8   : > { %2607 = vmatpush3.bf16.msra.mxu1 %v2694_v37 }
 0x6b6   : > { %v2085_v39 = vpop.f32.mrb[56].mxu1 }
 0x6b7   : > { %v2086_v40 = vadd.f32 %v2335_v38, %v2085_v39  ;;  %v2602_v41 = vpop.f32.mrb[57].mxu1 }
 0x6b8   : > { %v2088_v42 = vpop.f32.mrb[58].mxu1 }
 0x6b9   : > { %v2091_v43 = vmax.f32 %v2086_v40, 0.0  ;;  %v2603_v44 = vpop.f32.mrb[59].mxu1 }
 0x6bb   : > { %v2092_v45 = vpack.c.bf16 %v2091_v43, %v2091_v43 }
 0x6bd   : > { %2609 = vmatmul.mubr.msk.bf16.vlgmr.msra.gmra.mrb[60].mxu1 %vm1348_vm4, %v2092_v45 }
 0x790   : > { %v2153_v46 = vpop.f32.mrb[60].mxu1 }
 0x791   : > { %v2154_v47 = vadd.f32 %v2339_v0, %v2153_v46  ;;  %v2610_v48 = vpop.f32.mrb[61].mxu1 }
 0x792   : > { %v2156_v50 = vpop.f32.mrb[62].mxu1 }
 0x793   : > { %2159 = vst [vmem:[%s463_s15] sm:$0xff] %v2154_v47  ;;  %v2611_v51 = vpop.f32.mrb[63].mxu1 }
 0x794   : > { %2792 = shalt.err (!%p2789_p11)
}
 0x795   : > { %s2793_s23 = scalar_lea.hbm %s3322_s29, 128  ;;  %s2797_s19 = scalar_lea.hbm %s3376_s12, 256 }
 0x796   : > { %p2794_p13 = scmp.ne.s32.totalorder %s3322_s29, %s2793_s23  ;;  %p2798_p6 = scmp.lt.u32.totalorder %s3322_s29, %s3376_s12 }
 0x797   : > { %p2799_p5 = scmp.lt.u32.totalorder %s2797_s19, %s2793_s23  ;;  %p2801_p9 = scmp.lt.u32.totalorder %s2793_s23, %s3322_s29 }
 0x798   : > { %p2795_p1 = pnand %p2794_p13, %p3404_p10 }
 0x799   : > { %p2800_p12 = por %p2799_p5, %p2798_p6 }
 0x79a   : > { %p2796_p0 = pneg %p2795_p1 }
 0x79b   : > { %p2802_p2 = por %p2801_p9, %p2800_p12 }
 0x79d   : > { %p2803_p3 = pnand %p2802_p2, %p2796_p0 }
 0x79f   : > { %2806 = shalt.err (!%p2803_p3)
}
 0x7a0   : > { %2624 = dma.vmem_to_hbm [thread:$0]  (%p3404_p10), %s3324_s20, 128, %s3322_s29, %s2161_s14  }
 0x7a1 PF: > { %s3405_s7 = sld [smem:[#allocation14_spill]]  ;;  %s3406_s15 = sld [smem:[#allocation12_spill]] }
 0x7a2   : > { %s3407_s28 = sld [smem:[#allocation17_spill]] }
 0x7a7   : > { %p2646_p4 = scmp.ge.s32.totalorder %s3405_s7, 2  ;;  %s2186_s18 = sand.u32 1, %s3406_s15  }
 0x7a8   : > { %p3408_p7 = scmp.ne.s32.totalorder %s3407_s28, 0  ;;  %s2187_s25 = scalar_lea.sflag [#allocation4], %s2186_s18 }
 0x7aa   : > { %p2637_p8 = pnand %p2646_p4, %p3408_p7 }
 0x7ac   : > { %2832 = dma.done.wait (!%p2637_p8), %s2187_s25, 128  }
 0x7ad   : > { %2834 = vsyncadd (!%p2637_p8), %s2187_s25, 4294967168  ;;  %s3409_s24 = sld [smem:[#allocation15_spill]]  ;;  %s3410_s16 = sld [smem:[#allocation13_spill]] }
 0x7ae   : > { %s3411_s23 = sld [smem:[#allocation16_spill]]  ;;  %s3412_s21 = smov %s2841_s22 }
 0x7b3   : > { %p24_p11 = scmp.ge.s32.totalorder %s3409_s24, 4   ;;  %s3413_s22 = smov %s3410_s16 }
 0x7b5   :  { %26 = sbr.rel (!%p24_p11) target bundleno = 7 (0x7), region = 119 }
 0x7bc   :  { %2192 = vsyncpa [#allocation3], 1 }
 0x7bd   :  { %2194 = vsyncpa [#allocation3 + $0x1], 1 }
 0x7be   :  { %2195 = vsyncpa [#allocation6], 1 }
 0x7bf   :  { %2196 = vsyncpa [#allocation4], 1 }
 0x7c0   :  { %2198 = vsyncpa [#allocation4 + $0x1], 1 }

</bundles_post_ra>
